<compile_context>
chip_gen: v6e
topology: v6e:2x2x1
jax: 0.10.0
libtpu: 0.0.40
codegen_flags: <defaults>
</compile_context>

<pallas_src>
import functools

import jax
import jax.numpy as jnp
from jax.experimental import pallas as pl
from jax.experimental.pallas import tpu as pltpu

BN_EPS = 1e-5
LANE = 128
SUBLANE = 8


def _round_up(x, m):
    return (x + m - 1) // m * m


def conv_stats_kernel(p_ref, w_ref, conv_ref, part_ref):
    """Per M-tile: conv = patches @ W (MXU, f32 acc) + per-channel partial stats."""
    conv = jnp.dot(p_ref[...], w_ref[...], preferred_element_type=jnp.float32)
    conv_ref[...] = conv
    s = jnp.sum(conv, axis=0, keepdims=True)             # [1, C_pad]
    ss = jnp.sum(conv * conv, axis=0, keepdims=True)     # [1, C_pad]
    pad = jnp.zeros((SUBLANE - 2, conv.shape[1]), jnp.float32)
    part_ref[...] = jnp.concatenate([s, ss, pad], axis=0)


def bn_relu_kernel(conv_ref, scale_ref, shift_ref, o_ref):
    """y = relu(conv * scale + shift): one FMA + max per element."""
    y = conv_ref[...] * scale_ref[...] + shift_ref[...]
    o_ref[...] = jnp.maximum(y, 0.0).astype(o_ref.dtype)


def _im2col(x, kh, kw, padding, stride):
    # x: [N, Cin, H, W] -> patches: [N*OH*OW, KH*KW*Cin]
    n, cin, h, w = x.shape
    oh = (h + 2 * padding - kh) // stride + 1
    ow = (w + 2 * padding - kw) // stride + 1
    xp = jnp.pad(x, ((0, 0), (0, 0), (padding, padding), (padding, padding)))
    cols = []
    for i in range(kh):
        for j in range(kw):
            cols.append(xp[:, :, i:i + stride * oh:stride, j:j + stride * ow:stride])
    patches = jnp.stack(cols, axis=0)                     # [KH*KW, N, Cin, OH, OW]
    patches = jnp.transpose(patches, (1, 3, 4, 0, 2))     # [N, OH, OW, KH*KW, Cin]
    return patches.reshape(n * oh * ow, kh * kw * cin), oh, ow


@functools.partial(jax.jit, static_argnames=("padding", "stride", "tile_m"))
def conv_bn_relu(x, conv_w, conv_b, gamma, beta, *, padding, stride, tile_m=512):
    """x: [N, Cin, H, W] NCHW, conv_w: [Cout, Cin, KH, KW] (PyTorch layout)."""
    del conv_b  # pre-BN per-channel bias is cancelled exactly by BN mean subtraction
    n = x.shape[0]
    cout, cin, kh, kw = conv_w.shape
    patches, oh, ow = _im2col(x, kh, kw, padding, stride)   # [M, K]
    m, k = patches.shape

    # Lane-dense padding + M tiling.
    c_pad = _round_up(cout, LANE)
    k_pad = _round_up(k, LANE)
    tile_m = min(tile_m, _round_up(m, SUBLANE))
    m_pad = _round_up(m, tile_m)
    n_tiles = m_pad // tile_m

    patches_p = jnp.zeros((m_pad, k_pad), jnp.bfloat16)
    patches_p = patches_p.at[:m, :k].set(patches.astype(jnp.bfloat16))
    w_mat = jnp.transpose(conv_w, (2, 3, 1, 0)).reshape(k, cout)  # matches patch ordering
    w_p = jnp.zeros((k_pad, c_pad), jnp.bfloat16).at[:k, :cout].set(w_mat.astype(jnp.bfloat16))

    # Pass 1: tiled GEMM + per-tile partial statistics (fully parallel over M).
    bytes1 = patches_p.size * 2 + w_p.size * 2 + m_pad * c_pad * 4 + n_tiles * SUBLANE * c_pad * 4
    conv_flat, partials = pl.pallas_call(
        conv_stats_kernel,
        out_shape=(jax.ShapeDtypeStruct((m_pad, c_pad), jnp.float32),
                   jax.ShapeDtypeStruct((n_tiles * SUBLANE, c_pad), jnp.float32)),
        grid=(n_tiles,),
        in_specs=[pl.BlockSpec((tile_m, k_pad), lambda i: (i, 0)),
                  pl.BlockSpec((k_pad, c_pad), lambda i: (0, 0))],
        out_specs=(pl.BlockSpec((tile_m, c_pad), lambda i: (i, 0)),
                   pl.BlockSpec((SUBLANE, c_pad), lambda i: (i, 0))),
        compiler_params=pltpu.CompilerParams(dimension_semantics=("parallel",)),
        cost_estimate=pl.CostEstimate(flops=2 * m_pad * k_pad * c_pad,
                                      transcendentals=0, bytes_accessed=bytes1),
    )(patches_p, w_p)

    # Fold BN into per-channel scale/shift (tiny [1, C_pad] math in plain JAX).
    # Zero-padded M rows contribute 0 to both sums, so dividing by the true M is exact.
    stats = jnp.sum(partials.reshape(n_tiles, SUBLANE, c_pad), axis=0)
    mean = stats[0:1] / m
    var = jnp.maximum(stats[1:2] / m - mean * mean, 0.0)   # biased variance (PyTorch BN fwd)
    inv_std = jax.lax.rsqrt(var + BN_EPS)
    g_row = jnp.zeros((1, c_pad), jnp.float32).at[0, :cout].set(gamma.astype(jnp.float32))
    b_row = jnp.zeros((1, c_pad), jnp.float32).at[0, :cout].set(beta.astype(jnp.float32))
    scale = g_row * inv_std
    shift = b_row - mean * scale

    # Pass 2: scale/shift + ReLU (fully parallel over M).
    bytes2 = 2 * m_pad * c_pad * 4 + 2 * c_pad * 4
    out = pl.pallas_call(
        bn_relu_kernel,
        out_shape=jax.ShapeDtypeStruct((m_pad, c_pad), x.dtype),
        grid=(n_tiles,),
        in_specs=[pl.BlockSpec((tile_m, c_pad), lambda i: (i, 0)),
                  pl.BlockSpec((1, c_pad), lambda i: (0, 0)),
                  pl.BlockSpec((1, c_pad), lambda i: (0, 0))],
        out_specs=pl.BlockSpec((tile_m, c_pad), lambda i: (i, 0)),
        compiler_params=pltpu.CompilerParams(dimension_semantics=("parallel",)),
        cost_estimate=pl.CostEstimate(flops=2 * m_pad * c_pad,
                                      transcendentals=0, bytes_accessed=bytes2),
    )(conv_flat, scale, shift)

    # [M_pad, C_pad] -> slice pads -> [N, OH, OW, Cout] -> NCHW (module contract).
    out = out[:m, :cout].reshape(n, oh, ow, cout)
    return jnp.transpose(out, (0, 3, 1, 2))


def _reference(x, conv_w, conv_b, gamma, beta, padding, stride):
    conv = jax.lax.conv_general_dilated(
        x, conv_w, window_strides=(stride, stride),
        padding=[(padding, padding), (padding, padding)],
        dimension_numbers=("NCHW", "OIHW", "NCHW"))
    conv = conv + conv_b[None, :, None, None]
    mean = jnp.mean(conv, axis=(0, 2, 3), keepdims=True)
    var = jnp.mean((conv - mean) ** 2, axis=(0, 2, 3), keepdims=True)
    y = (conv - mean) * jax.lax.rsqrt(var + BN_EPS)
    y = y * gamma[None, :, None, None] + beta[None, :, None, None]
    return jnp.maximum(y, 0.0)


if __name__ == "__main__":
    key = jax.random.PRNGKey(0)
    N, Cin, H, W = 2, 4, 16, 16
    Cout, KH, KW = 8, 3, 3
    padding, stride = 1, 1

    k_x, k_w, k_b, k_g, k_be = jax.random.split(key, 5)
    x = jax.random.normal(k_x, (N, Cin, H, W), dtype=jnp.float32)
    conv_w = jax.random.normal(k_w, (Cout, Cin, KH, KW), dtype=jnp.float32) * 0.1
    conv_b = jax.random.normal(k_b, (Cout,), dtype=jnp.float32) * 0.1
    gamma = 1.0 + 0.1 * jax.random.normal(k_g, (Cout,), dtype=jnp.float32)
    beta = 0.1 * jax.random.normal(k_be, (Cout,), dtype=jnp.float32)

    # tile_m=256 so the small demo (M=512) exercises the multi-tile / partial-stat path.
    y = conv_bn_relu(x, conv_w, conv_b, gamma, beta,
                     padding=padding, stride=stride, tile_m=256)
    jax.block_until_ready(y)
    assert y.shape == (N, Cout, H, W), y.shape

    y_ref = _reference(x, conv_w, conv_b, gamma, beta, padding, stride)
    max_err = float(jnp.max(jnp.abs(y - y_ref)))
    assert max_err < 1e-1, f"max abs error vs reference: {max_err}"
    print("KERNEL_OK")
</pallas_src>

<mosaic_0001>
module attributes {stable_mosaic.version = 11 : i64} {
  func.func @conv_stats_kernel(%arg0: i32, %arg1: memref<256x128xbf16, #tpu.memory_space<vmem>>, %arg2: memref<128x128xbf16, #tpu.memory_space<vmem>>, %arg3: memref<256x128xf32, #tpu.memory_space<vmem>>, %arg4: memref<8x128xf32, #tpu.memory_space<vmem>>) attributes {dimension_semantics = [#tpu.dimension_semantics<parallel>], iteration_bounds = array<i64: 2>, scalar_prefetch = 0 : i64, scratch_operands = 0 : i64, tpu.core_type = #tpu.core_type<tc>, window_params = [{transform_indices = @transform_0, window_bounds = array<i64: 256, 128>}, {pipeline_mode = #tpu.pipeline_mode<synchronous>, transform_indices = @transform_1, window_bounds = array<i64: 128, 128>}, {transform_indices = @transform_2, window_bounds = array<i64: 256, 128>}, {transform_indices = @transform_3, window_bounds = array<i64: 8, 128>}]} {
    %c0 = arith.constant 0 : index
    %c0_0 = arith.constant 0 : index
    %0 = vector.load %arg1[%c0, %c0_0] : memref<256x128xbf16, #tpu.memory_space<vmem>>, vector<256x128xbf16>
    %c0_1 = arith.constant 0 : index
    %c0_2 = arith.constant 0 : index
    %1 = vector.load %arg2[%c0_1, %c0_2] : memref<128x128xbf16, #tpu.memory_space<vmem>>, vector<128x128xbf16>
    %cst = arith.constant dense<0.000000e+00> : vector<256x128xf32>
    %2 = tpu.matmul %0, %1, %cst {dimension_numbers = #tpu.dot_dimension_numbers<[1], [0], [0], [1], [0, 0, 1, 1], [], []>} : vector<256x128xbf16>, vector<128x128xbf16>, vector<256x128xf32> -> vector<256x128xf32>
    %c0_3 = arith.constant 0 : index
    %c0_4 = arith.constant 0 : index
    %3 = vector.load %arg3[%c0_3, %c0_4] : memref<256x128xf32, #tpu.memory_space<vmem>>, vector<256x128xf32>
    tpu.vector_store %arg3[%c0_3, %c0_4], %2 {strides = array<i32>} : memref<256x128xf32, #tpu.memory_space<vmem>>, vector<256x128xf32>,
    %cst_5 = arith.constant dense<0.000000e+00> : vector<128xf32>
    %4 = vector.multi_reduction <add>, %2, %cst_5 [0] : vector<256x128xf32> to vector<128xf32>
    %5 = vector.shape_cast %4 : vector<128xf32> to vector<1x128xf32>
    %6 = arith.mulf %2, %2 : vector<256x128xf32>
    %cst_6 = arith.constant dense<0.000000e+00> : vector<128xf32>
    %7 = vector.multi_reduction <add>, %6, %cst_6 [0] : vector<256x128xf32> to vector<128xf32>
    %8 = vector.shape_cast %7 : vector<128xf32> to vector<1x128xf32>
    %cst_7 = arith.constant 0.000000e+00 : f32
    %9 = vector.broadcast %cst_7 : f32 to vector<6x128xf32>
    %10 = tpu.concatenate %5, %8, %9 in 0 : vector<1x128xf32>, vector<1x128xf32>, vector<6x128xf32> -> vector<8x128xf32>
    %c0_8 = arith.constant 0 : index
    %c0_9 = arith.constant 0 : index
    %11 = vector.load %arg4[%c0_8, %c0_9] : memref<8x128xf32, #tpu.memory_space<vmem>>, vector<8x128xf32>
    tpu.vector_store %arg4[%c0_8, %c0_9], %10 {strides = array<i32>} : memref<8x128xf32, #tpu.memory_space<vmem>>, vector<8x128xf32>,
    return
  }
  func.func @transform_0(%arg0: i32) -> (i32, i32) {
    %c0_i32 = arith.constant 0 : i32
    %c0_i32_0 = arith.constant 0 : i32
    return %arg0, %c0_i32 : i32, i32
  }
  func.func @transform_1(%arg0: i32) -> (i32, i32) {
    %c0_i32 = arith.constant 0 : i32
    %c0_i32_0 = arith.constant 0 : i32
    %c0_i32_1 = arith.constant 0 : i32
    return %c0_i32, %c0_i32_0 : i32, i32
  }
  func.func @transform_2(%arg0: i32) -> (i32, i32) {
    %c0_i32 = arith.constant 0 : i32
    %c0_i32_0 = arith.constant 0 : i32
    return %arg0, %c0_i32 : i32, i32
  }
  func.func @transform_3(%arg0: i32) -> (i32, i32) {
    %c0_i32 = arith.constant 0 : i32
    %c0_i32_0 = arith.constant 0 : i32
    return %arg0, %c0_i32 : i32, i32
  }
}

module attributes {stable_mosaic.version = 11 : i64} {
  func.func @bn_relu_kernel(%arg0: i32, %arg1: memref<256x128xf32, #tpu.memory_space<vmem>>, %arg2: memref<1x128xf32, #tpu.memory_space<vmem>>, %arg3: memref<1x128xf32, #tpu.memory_space<vmem>>, %arg4: memref<256x128xf32, #tpu.memory_space<vmem>>) attributes {dimension_semantics = [#tpu.dimension_semantics<parallel>], iteration_bounds = array<i64: 2>, scalar_prefetch = 0 : i64, scratch_operands = 0 : i64, tpu.core_type = #tpu.core_type<tc>, window_params = [{transform_indices = @transform_0, window_bounds = array<i64: 256, 128>}, {pipeline_mode = #tpu.pipeline_mode<synchronous>, transform_indices = @transform_1, window_bounds = array<i64: 1, 128>}, {pipeline_mode = #tpu.pipeline_mode<synchronous>, transform_indices = @transform_2, window_bounds = array<i64: 1, 128>}, {transform_indices = @transform_3, window_bounds = array<i64: 256, 128>}]} {
    %c0 = arith.constant 0 : index
    %c0_0 = arith.constant 0 : index
    %0 = vector.load %arg1[%c0, %c0_0] : memref<256x128xf32, #tpu.memory_space<vmem>>, vector<256x128xf32>
    %c0_1 = arith.constant 0 : index
    %c0_2 = arith.constant 0 : index
    %1 = vector.load %arg2[%c0_1, %c0_2] : memref<1x128xf32, #tpu.memory_space<vmem>>, vector<1x128xf32>
    %2 = vector.broadcast %1 : vector<1x128xf32> to vector<256x128xf32>
    %3 = arith.mulf %0, %2 : vector<256x128xf32>
    %c0_3 = arith.constant 0 : index
    %c0_4 = arith.constant 0 : index
    %4 = vector.load %arg3[%c0_3, %c0_4] : memref<1x128xf32, #tpu.memory_space<vmem>>, vector<1x128xf32>
    %5 = vector.broadcast %4 : vector<1x128xf32> to vector<256x128xf32>
    %6 = arith.addf %3, %5 : vector<256x128xf32>
    %cst = arith.constant 0.000000e+00 : f32
    %7 = vector.broadcast %cst : f32 to vector<256x128xf32>
    %8 = arith.maximumf %6, %7 : vector<256x128xf32>
    %c0_5 = arith.constant 0 : index
    %c0_6 = arith.constant 0 : index
    %9 = vector.load %arg4[%c0_5, %c0_6] : memref<256x128xf32, #tpu.memory_space<vmem>>, vector<256x128xf32>
    tpu.vector_store %arg4[%c0_5, %c0_6], %8 {strides = array<i32>} : memref<256x128xf32, #tpu.memory_space<vmem>>, vector<256x128xf32>,
    return
  }
  func.func @transform_0(%arg0: i32) -> (i32, i32) {
    %c0_i32 = arith.constant 0 : i32
    %c0_i32_0 = arith.constant 0 : i32
    return %arg0, %c0_i32 : i32, i32
  }
  func.func @transform_1(%arg0: i32) -> (i32, i32) {
    %c0_i32 = arith.constant 0 : i32
    %c0_i32_0 = arith.constant 0 : i32
    %c0_i32_1 = arith.constant 0 : i32
    return %c0_i32, %c0_i32_0 : i32, i32
  }
  func.func @transform_2(%arg0: i32) -> (i32, i32) {
    %c0_i32 = arith.constant 0 : i32
    %c0_i32_0 = arith.constant 0 : i32
    %c0_i32_1 = arith.constant 0 : i32
    return %c0_i32, %c0_i32_0 : i32, i32
  }
  func.func @transform_3(%arg0: i32) -> (i32, i32) {
    %c0_i32 = arith.constant 0 : i32
    %c0_i32_0 = arith.constant 0 : i32
    return %arg0, %c0_i32 : i32, i32
  }
}

</mosaic_0001>

<bundles_post_ra>
// kernel: conv_bn_relu.2
= control target key start
LH: loop header
LB: loop body
LE: loop exit
PB: predicated region body
PF: predicated region fallthrough
CT: control target
= control target key end

     0   :  { %s953_s12 = smov 0   ;;  %s1142_s0 = inlined_call_operand.vmem [shape: bf16[512,128], index: 0, kind: input, shape index: {}]   ;;  %s1143_s1 = inlined_call_operand.vmem [shape: bf16[128,128], index: 1, kind: input, shape index: {}]   ;;  %s1144_s2 = inlined_call_operand.vmem [shape: f32[512,128], index: 2, kind: output, shape index: {0}]   ;;  %s1145_s3 = inlined_call_operand.vmem [shape: f32[16,128], index: 3, kind: output, shape index: {1}]  }
   0x1 LB: > { %s959_s13 = sadd.s32 4294967295, %s931_s12   ;;  %p773_p0 = scmp.ge.s32.totalorder %s931_s12, 1  ;;  %s931_s12 = sphi %s953_s12, %s14_s12  }
   0x2   : > { %p141_p1 = scmp.lt.s32.totalorder %s931_s12, 3 }
   0x4   : > { %p142_p2 = pnand %p773_p0, %p141_p1 }
   0x5   : > { %s774_s16 = sshll.u32 (!%p142_p2), %s959_s13, 5  ;;  %p181_p4 = scmp.lt.s32.totalorder (!%p142_p2), %s959_s13, 1 }
   0x6   : > { %145 = sbr.rel (%p142_p2) target bundleno = 322 (0x142), region = 28  ;;  %p170_p3 = scmp.lt.s32.totalorder (!%p142_p2), %s774_s16, 63 }
   0xb   : > { %v901_v0 = vld [vmem:[%s1143_s1 + $0x38] sm:$0xff]   ;;  %v902_v1 = vld [vmem:[%s1143_s1 + $0x30] sm:$0xff]   ;;  %s1147_s16 = smov (!%p170_p3, %s774_s16), 63  ;;  %v903_v2 = vld [vmem:[%s1143_s1 + $0x28] sm:$0xff]   ;;  %s1149_s13 = smov (!%p181_p4, %s959_s13), 1  ;;  %vm677_vm0 = vcmask 1040384  }
   0xc   : > { %829 = vmatprep.subr.bf16.mxu0 %v901_v0  ;;  %877 = vmatprep.subr.bf16.mxu1 %v901_v0  ;;  %s775_s21 = sshll.u32 %s1147_s16, 2  ;;  %v904_v3 = vld [vmem:[%s1143_s1 + $0x20] sm:$0xff]   ;;  %v905_v5 = vld [vmem:[%s1143_s1 + $0x18] sm:$0xff]   ;;  %v906_v6 = vld [vmem:[%s1143_s1 + $0x10] sm:$0xff]   ;;  %s777_s8 = sshll.u32 %s1147_s16, 3  ;;  %vm679_vm1 = vcmask 1041408  }
   0xd   : > { %830 = vmatpush3.bf16.msra.mxu0 %v901_v0  ;;  %885 = vmatpush3.bf16.msra.mxu1 %v901_v0  ;;  %s979_s24 = scalar_lea.vmem %s1142_s0, %s775_s21  ;;  %v907_v8 = vld [vmem:[%s1143_s1 + $0x8] sm:$0xff]   ;;  %v908_v9 = vld [vmem:[%s1143_s1] sm:$0xff]   ;;  %s1016_s11 = scalar_lea.vmem %s1144_s2, %s777_s8 }
   0xe   : > { %831 = vmatprep.subr.bf16.mxu0 %v902_v1  ;;  %878 = vmatprep.subr.bf16.mxu1 %v902_v1  ;;  %v909_v4 = vld [vmem:[%s979_s24] sm:$0xff]   ;;  %v910_v10 = vld [vmem:[%s979_s24 + $0x8] sm:$0xff]   ;;  %v911_v12 = vld [vmem:[%s979_s24 + $0x10] sm:$0xff]   ;;  %s778_s14 = sshll.u32 %s1149_s13, 3 }
   0xf   : > { %845 = vmatprep.mubr.bf16.mxu0 %v909_v4  ;;  %v917_v7 = vld [vmem:[%s979_s24 + $0x40] sm:$0xff]   ;;  %v918_v11 = vld [vmem:[%s979_s24 + $0x48] sm:$0xff]   ;;  %v919_v13 = vld [vmem:[%s979_s24 + $0x50] sm:$0xff]   ;;  %s184_s17 = scalar_lea.vmem %s1145_s3, %s778_s14 }
  0x10   : > { %861 = vmatprep.mubr.bf16.mxu1 %v917_v7  ;;  %v912_v14 = vld [vmem:[%s979_s24 + $0x18] sm:$0xff]   ;;  %v913_v16 = vld [vmem:[%s979_s24 + $0x20] sm:$0xff]   ;;  %v914_v18 = vld [vmem:[%s979_s24 + $0x28] sm:$0xff]  }
  0x11   : > { %832 = vmatpush3.bf16.msra.mxu0 %v902_v1  ;;  %886 = vmatpush3.bf16.msra.mxu1 %v902_v1  ;;  %v920_v15 = vld [vmem:[%s979_s24 + $0x58] sm:$0xff]   ;;  %v921_v17 = vld [vmem:[%s979_s24 + $0x60] sm:$0xff]   ;;  %v922_v19 = vld [vmem:[%s979_s24 + $0x68] sm:$0xff]  }
  0x12   : > { %833 = vmatprep.subr.bf16.mxu0 %v903_v2  ;;  %879 = vmatprep.subr.bf16.mxu1 %v903_v2  ;;  %v915_v20 = vld [vmem:[%s979_s24 + $0x30] sm:$0xff]   ;;  %v916_v22 = vld [vmem:[%s979_s24 + $0x38] sm:$0xff]  }
  0x13   : > { %v923_v21 = vld [vmem:[%s979_s24 + $0x70] sm:$0xff]   ;;  %v924_v23 = vld [vmem:[%s979_s24 + $0x78] sm:$0xff]  }
  0x15   : > { %834 = vmatpush3.bf16.msra.mxu0 %v903_v2  ;;  %887 = vmatpush3.bf16.msra.mxu1 %v903_v2 }
  0x16   : > { %835 = vmatprep.subr.bf16.mxu0 %v904_v3  ;;  %880 = vmatprep.subr.bf16.mxu1 %v904_v3 }
  0x19   : > { %836 = vmatpush3.bf16.msra.mxu0 %v904_v3  ;;  %888 = vmatpush3.bf16.msra.mxu1 %v904_v3 }
  0x1a   : > { %837 = vmatprep.subr.bf16.mxu0 %v905_v5  ;;  %881 = vmatprep.subr.bf16.mxu1 %v905_v5 }
  0x1d   : > { %838 = vmatpush3.bf16.msra.mxu0 %v905_v5  ;;  %889 = vmatpush3.bf16.msra.mxu1 %v905_v5 }
  0x1e   : > { %839 = vmatprep.subr.bf16.mxu0 %v906_v6  ;;  %882 = vmatprep.subr.bf16.mxu1 %v906_v6 }
  0x21   : > { %840 = vmatpush3.bf16.msra.mxu0 %v906_v6  ;;  %890 = vmatpush3.bf16.msra.mxu1 %v906_v6 }
  0x22   : > { %841 = vmatprep.subr.bf16.mxu0 %v907_v8  ;;  %883 = vmatprep.subr.bf16.mxu1 %v907_v8 }
  0x25   : > { %842 = vmatpush3.bf16.msra.mxu0 %v907_v8  ;;  %891 = vmatpush3.bf16.msra.mxu1 %v907_v8 }
  0x26   : > { %843 = vmatprep.subr.bf16.mxu0 %v908_v9  ;;  %884 = vmatprep.subr.bf16.mxu1 %v908_v9 }
  0x29   : > { %844 = vmatpush3.bf16.msra.mxu0 %v908_v9  ;;  %892 = vmatpush3.bf16.msra.mxu1 %v908_v9 }
  0x2c   : > { %846 = vmatmul.mubr.bf16.vlgmr.msra.gmra.mxu0 %v910_v10  ;;  %862 = vmatmul.mubr.bf16.vlgmr.msra.gmra.mxu1 %v918_v11 }
  0x2d   : > { %849 = vmatprep.mubr.bf16.mxu0 %v911_v12  ;;  %865 = vmatprep.mubr.bf16.mxu1 %v919_v13 }
  0x34   : > { %850 = vmatmul.mubr.bf16.gmra.mxu0 %v912_v14  ;;  %866 = vmatmul.mubr.bf16.gmra.mxu1 %v920_v15 }
  0x35   : > { %853 = vmatprep.mubr.bf16.mxu0 %v913_v16  ;;  %869 = vmatprep.mubr.bf16.mxu1 %v921_v17 }
  0x3c   : > { %854 = vmatmul.mubr.bf16.gmra.mxu0 %v914_v18  ;;  %870 = vmatmul.mubr.bf16.gmra.mxu1 %v922_v19 }
  0x3d   : > { %857 = vmatprep.mubr.bf16.mxu0 %v915_v20  ;;  %873 = vmatprep.mubr.bf16.mxu1 %v923_v21 }
  0x44   : > { %858 = vmatmul.mubr.bf16.gmra.mxu0 %v916_v22  ;;  %874 = vmatmul.mubr.bf16.gmra.mxu1 %v924_v23 }
  0xec   : > { %v847_v24 = vpop.f32.mrf.mxu0  ;;  %v1018_v25 = vpop.f32.mrf.mxu1 }
  0xed   : > { %541 = vst [vmem:[%s1016_s11 + $0x10] sm:$0xff] %v847_v24  ;;  %557 = vst [vmem:[%s1016_s11 + $0x90] sm:$0xff] %v1018_v25  ;;  %v610_v37 = vmul.f32 %v847_v24, %v847_v24 }
  0xee   : > { %v412_v26 = vpop.f32.mrf.mxu0  ;;  %v1023_v27 = vpop.f32.mrf.mxu1 }
  0xef   : > { %539 = vst [vmem:[%s1016_s11] sm:$0xff] %v412_v26  ;;  %555 = vst [vmem:[%s1016_s11 + $0x80] sm:$0xff] %v1023_v27  ;;  %v608_v32 = vmul.f32 %v412_v26, %v412_v26 }
  0xf0   : > { %v848_v28 = vpop.f32.mrf.mxu0  ;;  %v1028_v29 = vpop.f32.mrf.mxu1 }
  0xf1   : > { %542 = vst [vmem:[%s1016_s11 + $0x18] sm:$0xff] %v848_v28  ;;  %558 = vst [vmem:[%s1016_s11 + $0x98] sm:$0xff] %v1028_v29  ;;  %v611_v42 = vmul.f32 %v848_v28, %v848_v28 }
  0xf2   : > { %v415_v30 = vpop.f32.mrf.mxu0  ;;  %v1033_v31 = vpop.f32.mrf.mxu1 }
  0xf3   : > { %540 = vst [vmem:[%s1016_s11 + $0x8] sm:$0xff] %v415_v30  ;;  %v571_v33 = vadd.f32 %v415_v30, %v412_v26  ;;  %v609_v34 = vmul.f32 %v415_v30, %v415_v30  ;;  %556 = vst [vmem:[%s1016_s11 + $0x88] sm:$0xff] %v1033_v31 }
  0xf4   : > { %v851_v35 = vpop.f32.mrf.mxu0  ;;  %v1038_v36 = vpop.f32.mrf.mxu1 }
  0xf5   : > { %v572_v38 = vadd.f32 %v847_v24, %v571_v33  ;;  %v640_v39 = vadd.f32 %v609_v34, %v608_v32  ;;  %545 = vst [vmem:[%s1016_s11 + $0x30] sm:$0xff] %v851_v35  ;;  %561 = vst [vmem:[%s1016_s11 + $0xb0] sm:$0xff] %v1038_v36  ;;  %v614_v57 = vmul.f32 %v851_v35, %v851_v35 }
  0xf6   : > { %v428_v40 = vpop.f32.mrf.mxu0  ;;  %v1043_v41 = vpop.f32.mrf.mxu1 }
  0xf7   : > { %v641_v43 = vadd.f32 %v640_v39, %v610_v37  ;;  %543 = vst [vmem:[%s1016_s11 + $0x20] sm:$0xff] %v428_v40  ;;  %v573_v44 = vadd.f32 %v848_v28, %v572_v38  ;;  %559 = vst [vmem:[%s1016_s11 + $0xa0] sm:$0xff] %v1043_v41  ;;  %v612_v48 = vmul.f32 %v428_v40, %v428_v40 }
  0xf8   : > { %v852_v45 = vpop.f32.mrf.mxu0  ;;  %v1048_v46 = vpop.f32.mrf.mxu1 }
  0xf9   : > { %v574_v47 = vadd.f32 %v573_v44, %v428_v40  ;;  %v642_v49 = vadd.f32 %v641_v43, %v611_v42  ;;  %546 = vst [vmem:[%s1016_s11 + $0x38] sm:$0xff] %v852_v45  ;;  %562 = vst [vmem:[%s1016_s11 + $0xb8] sm:$0xff] %v1048_v46  ;;  %v615_v62 = vmul.f32 %v852_v45, %v852_v45 }
  0xfa   : > { %v431_v50 = vpop.f32.mrf.mxu0  ;;  %v1053_v51 = vpop.f32.mrf.mxu1  ;;  %v624_v43 = vmul.f32 %v1023_v27, %v1023_v27 }
  0xfb   : > { %v643_v52 = vadd.f32 %v642_v49, %v612_v48  ;;  %544 = vst [vmem:[%s1016_s11 + $0x28] sm:$0xff] %v431_v50  ;;  %v575_v53 = vadd.f32 %v574_v47, %v431_v50  ;;  %v613_v54 = vmul.f32 %v431_v50, %v431_v50  ;;  %560 = vst [vmem:[%s1016_s11 + $0xa8] sm:$0xff] %v1053_v51 }
  0xfc   : > { %v855_v55 = vpop.f32.mrf.mxu0  ;;  %v1058_v56 = vpop.f32.mrf.mxu1  ;;  %v625_v48 = vmul.f32 %v1033_v31, %v1033_v31  ;;  %v626_v50 = vmul.f32 %v1018_v25, %v1018_v25 }
  0xfd   : > { %v576_v58 = vadd.f32 %v851_v35, %v575_v53  ;;  %v644_v59 = vadd.f32 %v643_v52, %v613_v54  ;;  %549 = vst [vmem:[%s1016_s11 + $0x50] sm:$0xff] %v855_v55  ;;  %565 = vst [vmem:[%s1016_s11 + $0xd0] sm:$0xff] %v1058_v56  ;;  %v618_v13 = vmul.f32 %v855_v55, %v855_v55 }
  0xfe   : > { %v444_v60 = vpop.f32.mrf.mxu0  ;;  %v1063_v61 = vpop.f32.mrf.mxu1  ;;  %v627_v54 = vmul.f32 %v1028_v29, %v1028_v29 }
  0xff   : > { %v645_v63 = vadd.f32 %v644_v59, %v614_v57  ;;  %547 = vst [vmem:[%s1016_s11 + $0x40] sm:$0xff] %v444_v60  ;;  %v577_v0 = vadd.f32 %v852_v45, %v576_v58  ;;  %563 = vst [vmem:[%s1016_s11 + $0xc0] sm:$0xff] %v1063_v61  ;;  %v616_v4 = vmul.f32 %v444_v60, %v444_v60 }
 0x100   : > { %v856_v1 = vpop.f32.mrf.mxu0  ;;  %v1068_v2 = vpop.f32.mrf.mxu1  ;;  %v628_v58 = vmul.f32 %v1043_v41, %v1043_v41 }
 0x101   : > { %v578_v3 = vadd.f32 %v577_v0, %v444_v60  ;;  %v646_v5 = vadd.f32 %v645_v63, %v615_v62  ;;  %550 = vst [vmem:[%s1016_s11 + $0x58] sm:$0xff] %v856_v1  ;;  %566 = vst [vmem:[%s1016_s11 + $0xd8] sm:$0xff] %v1068_v2  ;;  %v619_v18 = vmul.f32 %v856_v1, %v856_v1 }
 0x102   : > { %v447_v6 = vpop.f32.mrf.mxu0  ;;  %v1073_v7 = vpop.f32.mrf.mxu1  ;;  %v629_v62 = vmul.f32 %v1053_v51, %v1053_v51 }
 0x103   : > { %v647_v8 = vadd.f32 %v646_v5, %v616_v4  ;;  %548 = vst [vmem:[%s1016_s11 + $0x48] sm:$0xff] %v447_v6  ;;  %v579_v9 = vadd.f32 %v578_v3, %v447_v6  ;;  %v617_v10 = vmul.f32 %v447_v6, %v447_v6  ;;  %564 = vst [vmem:[%s1016_s11 + $0xc8] sm:$0xff] %v1073_v7 }
 0x104   : > { %v859_v11 = vpop.f32.mrf.mxu0  ;;  %v1078_v12 = vpop.f32.mrf.mxu1  ;;  %v632_v4 = vmul.f32 %v1063_v61, %v1063_v61 }
 0x105   : > { %v580_v14 = vadd.f32 %v855_v55, %v579_v9  ;;  %v648_v15 = vadd.f32 %v647_v8, %v617_v10  ;;  %553 = vst [vmem:[%s1016_s11 + $0x70] sm:$0xff] %v859_v11  ;;  %569 = vst [vmem:[%s1016_s11 + $0xf0] sm:$0xff] %v1078_v12  ;;  %v622_v35 = vmul.f32 %v859_v11, %v859_v11 }
 0x106   : > { %v460_v16 = vpop.f32.mrf.mxu0  ;;  %v524_v17 = vpop.f32.mrf.mxu1  ;;  %v633_v8 = vmul.f32 %v1073_v7, %v1073_v7 }
 0x107   : > { %v649_v19 = vadd.f32 %v648_v15, %v618_v13  ;;  %551 = vst [vmem:[%s1016_s11 + $0x60] sm:$0xff] %v460_v16  ;;  %v581_v20 = vadd.f32 %v856_v1, %v580_v14  ;;  %567 = vst [vmem:[%s1016_s11 + $0xe0] sm:$0xff] %v524_v17  ;;  %v620_v24 = vmul.f32 %v460_v16, %v460_v16 }
 0x108   : > { %v860_v21 = vpop.f32.mrf.mxu0  ;;  %v1085_v22 = vpop.f32.mrf.mxu1  ;;  %v636_v14 = vmul.f32 %v524_v17, %v524_v17 }
 0x109   : > { %v582_v23 = vadd.f32 %v581_v20, %v460_v16  ;;  %v650_v26 = vadd.f32 %v649_v19, %v619_v18  ;;  %554 = vst [vmem:[%s1016_s11 + $0x78] sm:$0xff] %v860_v21  ;;  %570 = vst [vmem:[%s1016_s11 + $0xf8] sm:$0xff] %v1085_v22  ;;  %v623_v39 = vmul.f32 %v860_v21, %v860_v21 }
 0x10a   : > { %v463_v28 = vpop.f32.mrf.mxu0  ;;  %v527_v30 = vpop.f32.mrf.mxu1  ;;  %v638_v19 = vmul.f32 %v1078_v12, %v1078_v12 }
 0x10b   : > { %v651_v32 = vadd.f32 %v650_v26, %v620_v24  ;;  %552 = vst [vmem:[%s1016_s11 + $0x68] sm:$0xff] %v463_v28  ;;  %v583_v33 = vadd.f32 %v582_v23, %v463_v28  ;;  %v621_v34 = vmul.f32 %v463_v28, %v463_v28  ;;  %568 = vst [vmem:[%s1016_s11 + $0xe8] sm:$0xff] %v527_v30 }
 0x10d   : > { %v584_v37 = vadd.f32 %v859_v11, %v583_v33  ;;  %v652_v38 = vadd.f32 %v651_v32, %v621_v34 }
 0x10f   : > { %v585_v40 = vadd.f32 %v860_v21, %v584_v37  ;;  %v653_v42 = vadd.f32 %v652_v38, %v622_v35  ;;  %v639_v21 = vmul.f32 %v1085_v22, %v1085_v22 }
 0x111   : > { %v654_v44 = vadd.f32 %v653_v42, %v623_v39  ;;  %v586_v45 = vadd.f32 %v585_v40, %v1023_v27 }
 0x113   : > { %v587_v47 = vadd.f32 %v586_v45, %v1033_v31  ;;  %v655_v49 = vadd.f32 %v654_v44, %v624_v43 }
 0x115   : > { %v588_v52 = vadd.f32 %v1018_v25, %v587_v47  ;;  %v656_v53 = vadd.f32 %v655_v49, %v625_v48  ;;  %v630_v25 = vmul.f32 %v1038_v36, %v1038_v36 }
 0x117   : > { %v657_v55 = vadd.f32 %v656_v53, %v626_v50  ;;  %v589_v57 = vadd.f32 %v1028_v29, %v588_v52  ;;  %v631_v29 = vmul.f32 %v1048_v46, %v1048_v46 }
 0x119   : > { %v590_v27 = vadd.f32 %v589_v57, %v1043_v41  ;;  %v658_v59 = vadd.f32 %v657_v55, %v627_v54 }
 0x11b   : > { %v659_v31 = vadd.f32 %v658_v59, %v628_v58  ;;  %v591_v60 = vadd.f32 %v590_v27, %v1053_v51 }
 0x11d   : > { %v592_v63 = vadd.f32 %v1038_v36, %v591_v60  ;;  %v660_v0 = vadd.f32 %v659_v31, %v629_v62  ;;  %v634_v36 = vmul.f32 %v1058_v56, %v1058_v56 }
 0x11f   : > { %v661_v1 = vadd.f32 %v660_v0, %v630_v25  ;;  %v593_v3 = vadd.f32 %v1048_v46, %v592_v63  ;;  %v635_v46 = vmul.f32 %v1068_v2, %v1068_v2 }
 0x121   : > { %v594_v41 = vadd.f32 %v593_v3, %v1063_v61  ;;  %v662_v5 = vadd.f32 %v661_v1, %v631_v29 }
 0x123   : > { %v663_v6 = vadd.f32 %v662_v5, %v632_v4  ;;  %v595_v51 = vadd.f32 %v594_v41, %v1073_v7  ;;  %v637_v7 = vmul.f32 %v527_v30, %v527_v30 }
 0x125   : > { %v596_v9 = vadd.f32 %v1058_v56, %v595_v51  ;;  %v664_v10 = vadd.f32 %v663_v6, %v633_v8 }
 0x127   : > { %v665_v11 = vadd.f32 %v664_v10, %v634_v36  ;;  %v597_v61 = vadd.f32 %v1068_v2, %v596_v9 }
 0x129   : > { %v598_v13 = vadd.f32 %v597_v61, %v524_v17  ;;  %v666_v15 = vadd.f32 %v665_v11, %v635_v46 }
 0x12b   : > { %v667_v16 = vadd.f32 %v666_v15, %v636_v14  ;;  %v599_v18 = vadd.f32 %v598_v13, %v527_v30 }
 0x12d   : > { %v600_v56 = vadd.f32 %v1078_v12, %v599_v18  ;;  %v668_v20 = vadd.f32 %v667_v16, %v637_v7 }
 0x12f   : > { %v601_v23 = vadd.f32 %v1085_v22, %v600_v56  ;;  %v669_v24 = vadd.f32 %v668_v20, %v638_v19 }
 0x131   : > { %v602_v2 = vrot.slane %v601_v23, 4  ;;  %v670_v26 = vadd.f32 %v669_v24, %v639_v21 }
 0x133   : > { %v603_v17 = vadd.f32 %v602_v2, %v601_v23  ;;  %v671_v28 = vrot.slane %v670_v26, 4 }
 0x135   : > { %v604_v32 = vrot.slane %v603_v17, 2  ;;  %v672_v33 = vadd.f32 %v671_v28, %v670_v26 }
 0x137   : > { %v605_v30 = vadd.f32 %v604_v32, %v603_v17  ;;  %v673_v34 = vrot.slane %v672_v33, 2 }
 0x139   : > { %v606_v35 = vrot.slane %v605_v30, 1  ;;  %v674_v37 = vadd.f32 %v673_v34, %v672_v33 }
 0x13b   : > { %v675_v12 = vrot.slane %v674_v37, 1  ;;  %v607_v38 = vadd.f32 %v606_v35, %v605_v30 }
 0x13d   : > { %v676_v39 = vadd.f32 %v675_v12, %v674_v37 }
 0x13f   : > { %v678_v22 = vsel %vm677_vm0, %v607_v38, %v676_v39 }
 0x140   : > { %v680_v40 = vsel %vm679_vm1, %v678_v22, 0.0 }
 0x141   : > { %681 = vst [vmem:[%s184_s17] sm:$0xff] %v680_v40 }
 0x142 PF: > { %s14_s12 = sadd.s32 1, %s931_s12  }
 0x143   : > { %p11_p5 = scmp.ge.s32.totalorder %s14_s12, 4  }
 0x145   :  { %13 = sbr.rel (!%p11_p5) target bundleno = 1 (0x1), region = 70 }

// kernel: conv_bn_relu.3
= control target key start
LH: loop header
LB: loop body
LE: loop exit
PB: predicated region body
PF: predicated region fallthrough
CT: control target
= control target key end

     0   :  { %s453_s12 = smov 0   ;;  %s612_s0 = inlined_call_operand.vmem [shape: f32[512,128], index: 0, kind: input, shape index: {}]   ;;  %s613_s1 = inlined_call_operand.vmem [shape: f32[1,128], index: 1, kind: input, shape index: {}]   ;;  %s614_s2 = inlined_call_operand.vmem [shape: f32[1,128], index: 2, kind: input, shape index: {}]   ;;  %s615_s3 = inlined_call_operand.vmem [shape: f32[512,128], index: 3, kind: output, shape index: {}]  }
   0x1 LB: > { %s404_s13 = sadd.s32 4294967295, %s431_s12   ;;  %p408_p0 = scmp.ge.s32.totalorder %s431_s12, 1  ;;  %s431_s12 = sphi %s453_s12, %s13_s12  }
   0x2   : > { %p138_p1 = scmp.lt.s32.totalorder %s431_s12, 3 }
   0x4   : > { %p139_p2 = pnand %p408_p0, %p138_p1 }
   0x5   : > { %s409_s14 = sshll.u32 (!%p139_p2), %s404_s13, 5 }
   0x6   : > { %142 = sbr.rel (%p139_p2) target bundleno = 44 (0x2c), region = 32  ;;  %p163_p3 = scmp.lt.s32.totalorder (!%p139_p2), %s409_s14, 63 }
   0xb   : > { %s617_s14 = smov (!%p163_p3, %s409_s14), 63  ;;  %v464_v0 = vld [vmem:[%s613_s1] ss:$0 sm:$0xff] }
   0xc   : > { %s410_s15 = sshll.u32 %s617_s14, 3  ;;  %v474_v1 = vld [vmem:[%s614_s2] ss:$0 sm:$0xff] }
   0xd   : > { %s469_s20 = scalar_lea.vmem %s612_s0, %s410_s15  ;;  %s497_s25 = scalar_lea.vmem %s615_s3, %s410_s15 }
   0xe   : > { %v174_v2 = vld [vmem:[%s469_s20] sm:$0xff]  ;;  %v175_v3 = vld [vmem:[%s469_s20 + $0x8] sm:$0xff]  ;;  %v176_v4 = vld [vmem:[%s469_s20 + $0x10] sm:$0xff] }
   0xf   : > { %v213_v5 = vmul.f32 %v464_v0, %v174_v2  ;;  %v214_v6 = vmul.f32 %v464_v0, %v175_v3  ;;  %v215_v7 = vmul.f32 %v464_v0, %v176_v4  ;;  %v177_v8 = vld [vmem:[%s469_s20 + $0x18] sm:$0xff]  ;;  %v178_v9 = vld [vmem:[%s469_s20 + $0x20] sm:$0xff]  ;;  %v179_v10 = vld [vmem:[%s469_s20 + $0x28] sm:$0xff] }
  0x10   : > { %v216_v11 = vmul.f32 %v464_v0, %v177_v8  ;;  %v217_v12 = vmul.f32 %v464_v0, %v178_v9  ;;  %v218_v13 = vmul.f32 %v464_v0, %v179_v10  ;;  %v180_v14 = vld [vmem:[%s469_s20 + $0x30] sm:$0xff]  ;;  %v181_v15 = vld [vmem:[%s469_s20 + $0x38] sm:$0xff]  ;;  %v182_v24 = vld [vmem:[%s469_s20 + $0x40] sm:$0xff] }
  0x11   : > { %v252_v16 = vadd.f32 %v474_v1, %v213_v5  ;;  %v253_v17 = vadd.f32 %v474_v1, %v214_v6  ;;  %v254_v18 = vadd.f32 %v474_v1, %v215_v7  ;;  %v219_v19 = vmul.f32 %v464_v0, %v180_v14  ;;  %v183_v25 = vld [vmem:[%s469_s20 + $0x48] sm:$0xff]  ;;  %v184_v26 = vld [vmem:[%s469_s20 + $0x50] sm:$0xff]  ;;  %v185_v31 = vld [vmem:[%s469_s20 + $0x58] sm:$0xff] }
  0x12   : > { %v255_v20 = vadd.f32 %v474_v1, %v216_v11  ;;  %v256_v21 = vadd.f32 %v474_v1, %v217_v12  ;;  %v257_v22 = vadd.f32 %v474_v1, %v218_v13  ;;  %v220_v23 = vmul.f32 %v464_v0, %v181_v15  ;;  %v186_v32 = vld [vmem:[%s469_s20 + $0x60] sm:$0xff]  ;;  %v187_v33 = vld [vmem:[%s469_s20 + $0x68] sm:$0xff]  ;;  %v188_v38 = vld [vmem:[%s469_s20 + $0x70] sm:$0xff] }
  0x13   : > { %v284_v27 = vmax.f32 %v252_v16, 0.0  ;;  %v285_v28 = vmax.f32 %v253_v17, 0.0  ;;  %v286_v29 = vmax.f32 %v254_v18, 0.0  ;;  %v258_v30 = vadd.f32 %v474_v1, %v219_v19  ;;  %v189_v43 = vld [vmem:[%s469_s20 + $0x78] sm:$0xff]  ;;  %v190_v56 = vld [vmem:[%s469_s20 + $0x80] sm:$0xff]  ;;  %v191_v57 = vld [vmem:[%s469_s20 + $0x88] sm:$0xff] }
  0x14   : > { %v287_v34 = vmax.f32 %v255_v20, 0.0  ;;  %v288_v35 = vmax.f32 %v256_v21, 0.0  ;;  %v289_v36 = vmax.f32 %v257_v22, 0.0  ;;  %v259_v37 = vadd.f32 %v474_v1, %v220_v23  ;;  %v192_v58 = vld [vmem:[%s469_s20 + $0x90] sm:$0xff]  ;;  %v193_v63 = vld [vmem:[%s469_s20 + $0x98] sm:$0xff]  ;;  %v194_v2 = vld [vmem:[%s469_s20 + $0xa0] sm:$0xff] }
  0x15   : > { %316 = vst [vmem:[%s497_s25] sm:$0xff] %v284_v27  ;;  %317 = vst [vmem:[%s497_s25 + $0x8] sm:$0xff] %v285_v28  ;;  %v290_v39 = vmax.f32 %v258_v30, 0.0  ;;  %v221_v40 = vmul.f32 %v464_v0, %v182_v24  ;;  %v222_v41 = vmul.f32 %v464_v0, %v183_v25  ;;  %v223_v42 = vmul.f32 %v464_v0, %v184_v26  ;;  %v195_v3 = vld [vmem:[%s469_s20 + $0xa8] sm:$0xff]  ;;  %v196_v8 = vld [vmem:[%s469_s20 + $0xb0] sm:$0xff] }
  0x16   : > { %318 = vst [vmem:[%s497_s25 + $0x10] sm:$0xff] %v286_v29  ;;  %319 = vst [vmem:[%s497_s25 + $0x18] sm:$0xff] %v287_v34  ;;  %v291_v44 = vmax.f32 %v259_v37, 0.0  ;;  %v224_v45 = vmul.f32 %v464_v0, %v185_v31  ;;  %v225_v46 = vmul.f32 %v464_v0, %v186_v32  ;;  %v226_v47 = vmul.f32 %v464_v0, %v187_v33  ;;  %v197_v13 = vld [vmem:[%s469_s20 + $0xb8] sm:$0xff]  ;;  %v198_v26 = vld [vmem:[%s469_s20 + $0xc0] sm:$0xff] }
  0x17   : > { %320 = vst [vmem:[%s497_s25 + $0x20] sm:$0xff] %v288_v35  ;;  %321 = vst [vmem:[%s497_s25 + $0x28] sm:$0xff] %v289_v36  ;;  %v260_v48 = vadd.f32 %v474_v1, %v221_v40  ;;  %v261_v49 = vadd.f32 %v474_v1, %v222_v41  ;;  %v262_v50 = vadd.f32 %v474_v1, %v223_v42  ;;  %v199_v27 = vld [vmem:[%s469_s20 + $0xc8] sm:$0xff]  ;;  %v200_v28 = vld [vmem:[%s469_s20 + $0xd0] sm:$0xff] }
  0x18   : > { %322 = vst [vmem:[%s497_s25 + $0x30] sm:$0xff] %v290_v39  ;;  %v227_v51 = vmul.f32 %v464_v0, %v188_v38  ;;  %323 = vst [vmem:[%s497_s25 + $0x38] sm:$0xff] %v291_v44  ;;  %v263_v52 = vadd.f32 %v474_v1, %v224_v45  ;;  %v264_v53 = vadd.f32 %v474_v1, %v225_v46  ;;  %v201_v33 = vld [vmem:[%s469_s20 + $0xd8] sm:$0xff]  ;;  %v202_v34 = vld [vmem:[%s469_s20 + $0xe0] sm:$0xff] }
  0x19   : > { %v265_v54 = vadd.f32 %v474_v1, %v226_v47  ;;  %v228_v55 = vmul.f32 %v464_v0, %v189_v43  ;;  %v292_v59 = vmax.f32 %v260_v48, 0.0  ;;  %v293_v60 = vmax.f32 %v261_v49, 0.0  ;;  %v203_v35 = vld [vmem:[%s469_s20 + $0xe8] sm:$0xff]  ;;  %v204_v40 = vld [vmem:[%s469_s20 + $0xf0] sm:$0xff]  ;;  %v205_v45 = vld [vmem:[%s469_s20 + $0xf8] sm:$0xff] }
  0x1a   : > { %v294_v61 = vmax.f32 %v262_v50, 0.0  ;;  %v266_v62 = vadd.f32 %v474_v1, %v227_v51  ;;  %v295_v4 = vmax.f32 %v263_v52, 0.0  ;;  %v296_v5 = vmax.f32 %v264_v53, 0.0 }
  0x1b   : > { %v297_v6 = vmax.f32 %v265_v54, 0.0  ;;  %v267_v7 = vadd.f32 %v474_v1, %v228_v55  ;;  %324 = vst [vmem:[%s497_s25 + $0x40] sm:$0xff] %v292_v59  ;;  %325 = vst [vmem:[%s497_s25 + $0x48] sm:$0xff] %v293_v60  ;;  %v229_v10 = vmul.f32 %v464_v0, %v190_v56  ;;  %v230_v11 = vmul.f32 %v464_v0, %v191_v57 }
  0x1c   : > { %326 = vst [vmem:[%s497_s25 + $0x50] sm:$0xff] %v294_v61  ;;  %v298_v9 = vmax.f32 %v266_v62, 0.0  ;;  %v231_v12 = vmul.f32 %v464_v0, %v192_v58  ;;  %327 = vst [vmem:[%s497_s25 + $0x58] sm:$0xff] %v295_v4  ;;  %v232_v15 = vmul.f32 %v464_v0, %v193_v63  ;;  %v233_v16 = vmul.f32 %v464_v0, %v194_v2 }
  0x1d   : > { %328 = vst [vmem:[%s497_s25 + $0x60] sm:$0xff] %v296_v5  ;;  %329 = vst [vmem:[%s497_s25 + $0x68] sm:$0xff] %v297_v6  ;;  %v299_v14 = vmax.f32 %v267_v7, 0.0  ;;  %v234_v17 = vmul.f32 %v464_v0, %v195_v3  ;;  %v268_v18 = vadd.f32 %v474_v1, %v229_v10  ;;  %v269_v19 = vadd.f32 %v474_v1, %v230_v11 }
  0x1e   : > { %330 = vst [vmem:[%s497_s25 + $0x70] sm:$0xff] %v298_v9  ;;  %v270_v20 = vadd.f32 %v474_v1, %v231_v12  ;;  %v235_v21 = vmul.f32 %v464_v0, %v196_v8  ;;  %v271_v22 = vadd.f32 %v474_v1, %v232_v15  ;;  %v272_v23 = vadd.f32 %v474_v1, %v233_v16 }
  0x1f   : > { %331 = vst [vmem:[%s497_s25 + $0x78] sm:$0xff] %v299_v14  ;;  %v273_v24 = vadd.f32 %v474_v1, %v234_v17  ;;  %v236_v25 = vmul.f32 %v464_v0, %v197_v13  ;;  %v300_v29 = vmax.f32 %v268_v18, 0.0  ;;  %v301_v30 = vmax.f32 %v269_v19, 0.0 }
  0x20   : > { %v302_v31 = vmax.f32 %v270_v20, 0.0  ;;  %v274_v32 = vadd.f32 %v474_v1, %v235_v21  ;;  %v303_v36 = vmax.f32 %v271_v22, 0.0  ;;  %v304_v37 = vmax.f32 %v272_v23, 0.0 }
  0x21   : > { %v305_v38 = vmax.f32 %v273_v24, 0.0  ;;  %v275_v39 = vadd.f32 %v474_v1, %v236_v25  ;;  %332 = vst [vmem:[%s497_s25 + $0x80] sm:$0xff] %v300_v29  ;;  %333 = vst [vmem:[%s497_s25 + $0x88] sm:$0xff] %v301_v30  ;;  %v237_v42 = vmul.f32 %v464_v0, %v198_v26  ;;  %v238_v43 = vmul.f32 %v464_v0, %v199_v27 }
  0x22   : > { %334 = vst [vmem:[%s497_s25 + $0x90] sm:$0xff] %v302_v31  ;;  %v306_v41 = vmax.f32 %v274_v32, 0.0  ;;  %v239_v44 = vmul.f32 %v464_v0, %v200_v28  ;;  %335 = vst [vmem:[%s497_s25 + $0x98] sm:$0xff] %v303_v36  ;;  %v240_v47 = vmul.f32 %v464_v0, %v201_v33  ;;  %v241_v48 = vmul.f32 %v464_v0, %v202_v34 }
  0x23   : > { %336 = vst [vmem:[%s497_s25 + $0xa0] sm:$0xff] %v304_v37  ;;  %337 = vst [vmem:[%s497_s25 + $0xa8] sm:$0xff] %v305_v38  ;;  %v307_v46 = vmax.f32 %v275_v39, 0.0  ;;  %v242_v49 = vmul.f32 %v464_v0, %v203_v35  ;;  %v276_v50 = vadd.f32 %v474_v1, %v237_v42  ;;  %v277_v51 = vadd.f32 %v474_v1, %v238_v43 }
  0x24   : > { %338 = vst [vmem:[%s497_s25 + $0xb0] sm:$0xff] %v306_v41  ;;  %v278_v52 = vadd.f32 %v474_v1, %v239_v44  ;;  %v243_v53 = vmul.f32 %v464_v0, %v204_v40  ;;  %v279_v54 = vadd.f32 %v474_v1, %v240_v47  ;;  %v280_v55 = vadd.f32 %v474_v1, %v241_v48 }
  0x25   : > { %339 = vst [vmem:[%s497_s25 + $0xb8] sm:$0xff] %v307_v46  ;;  %v281_v56 = vadd.f32 %v474_v1, %v242_v49  ;;  %v244_v57 = vmul.f32 %v464_v0, %v205_v45  ;;  %v308_v58 = vmax.f32 %v276_v50, 0.0  ;;  %v309_v59 = vmax.f32 %v277_v51, 0.0 }
  0x26   : > { %v310_v60 = vmax.f32 %v278_v52, 0.0  ;;  %v282_v61 = vadd.f32 %v474_v1, %v243_v53  ;;  %v311_v62 = vmax.f32 %v279_v54, 0.0  ;;  %v312_v63 = vmax.f32 %v280_v55, 0.0 }
  0x27   : > { %v313_v2 = vmax.f32 %v281_v56, 0.0  ;;  %v283_v3 = vadd.f32 %v474_v1, %v244_v57  ;;  %340 = vst [vmem:[%s497_s25 + $0xc0] sm:$0xff] %v308_v58  ;;  %341 = vst [vmem:[%s497_s25 + $0xc8] sm:$0xff] %v309_v59 }
  0x28   : > { %342 = vst [vmem:[%s497_s25 + $0xd0] sm:$0xff] %v310_v60  ;;  %v314_v4 = vmax.f32 %v282_v61, 0.0  ;;  %343 = vst [vmem:[%s497_s25 + $0xd8] sm:$0xff] %v311_v62 }
  0x29   : > { %344 = vst [vmem:[%s497_s25 + $0xe0] sm:$0xff] %v312_v63  ;;  %345 = vst [vmem:[%s497_s25 + $0xe8] sm:$0xff] %v313_v2  ;;  %v315_v0 = vmax.f32 %v283_v3, 0.0 }
  0x2a   : > { %346 = vst [vmem:[%s497_s25 + $0xf0] sm:$0xff] %v314_v4 }
  0x2b   : > { %347 = vst [vmem:[%s497_s25 + $0xf8] sm:$0xff] %v315_v0 }
  0x2c PF: > { %s13_s12 = sadd.s32 1, %s431_s12  }
  0x2d   : > { %p10_p4 = scmp.ge.s32.totalorder %s13_s12, 4  }
  0x2f   :  { %12 = sbr.rel (!%p10_p4) target bundleno = 1 (0x1), region = 62 }

</bundles_post_ra>
